<compile_context>
chip_gen: v7x
topology: tpu7x:2x2x1
jax: 0.10.0
libtpu: 0.0.40
codegen_flags: <defaults>
</compile_context>

<pallas_src>
import functools

import jax
import jax.numpy as jnp
import numpy as np
from jax import lax
from jax.experimental import pallas as pl
from jax.experimental.pallas import tpu as pltpu


# ----------------------------- Pallas kernel -------------------------------

def _conv_bn_relu_kernel(x_ref, w_ref, b_ref, g_ref, bb_ref, gs_ref,
                         o_ref, stats_ref, *, tr, inv_n, eps):
    """Fused 3x3 conv (one bf16 MXU matmul per row tile) + BN batch stats + ReLU.

    x_ref:     (TR, 3*(W+2)*Cin) bf16    pre-stacked kh row windows (aligned block)
    w_ref:     (3*(W+2)*Cin, W*Cout) bf16  banded im2col conv weight
    b_ref:     (1, W*Cout) f32           conv bias tiled across W
    g_ref:     (1, W*Cout) f32           BN gamma tiled across W
    bb_ref:    (1, W*Cout) f32           BN beta tiled across W
    gs_ref:    (W*Cout, W*Cout) f32      group-sum matrix (reduce lanes over W per cout)
    o_ref:     (N*H, W*Cout) f32         full output, VMEM-resident across the grid
    stats_ref: (8, W*Cout) f32 scratch   row0 = sum, row1 = sum of squares
    """
    t = pl.program_id(0)
    nt = pl.num_programs(0)

    # ---------- phase 1 (every step): conv row tile + BN partial stats ----------
    acc = jnp.dot(x_ref[...], w_ref[...], preferred_element_type=jnp.float32)
    acc = acc + b_ref[...]                                     # (TR, W*Cout) f32

    row0 = pl.multiple_of(t * tr, tr)
    o_ref[pl.ds(row0, tr), :] = acc                            # park conv result in VMEM

    @pl.when(t == 0)
    def _():
        stats_ref[...] = jnp.zeros_like(stats_ref)

    stats_ref[0:1, :] = stats_ref[0:1, :] + jnp.sum(acc, axis=0, keepdims=True)
    stats_ref[1:2, :] = stats_ref[1:2, :] + jnp.sum(acc * acc, axis=0, keepdims=True)

    # ---------- phase 2 (last step): fold BN into per-lane FMA, normalize + ReLU ----------
    @pl.when(t == nt - 1)
    def _():
        # Per-(w, cout) lane sums -> per-cout totals broadcast back onto the lanes,
        # via one tiny MXU matmul (avoids cross-lane reshapes on the VPU/XLU).
        tot = jnp.dot(stats_ref[...], gs_ref[...],
                      preferred_element_type=jnp.float32)      # (8, W*Cout)
        mean = tot[0:1, :] * inv_n
        ex2 = tot[1:2, :] * inv_n
        var = jnp.maximum(ex2 - mean * mean, 0.0)              # biased (training mode)
        scale = g_ref[...] * lax.rsqrt(var + eps)
        shift = bb_ref[...] - mean * scale
        # Elementwise math in f32 (v5e has no bf16 VPU); single FMA + ReLU in place.
        o_ref[...] = jnp.maximum(o_ref[...] * scale + shift, 0.0)


# ------------------------------ Wrapper -----------------------------------

def _banded_weight(w_oihw, W):
    """Fold the 3x3 im2col into one (3*(W+2)*Cin, W*Cout) matmul operand."""
    Cout, Cin, KH, KW = w_oihw.shape
    w_hwio = jnp.transpose(w_oihw, (2, 3, 1, 0)).astype(jnp.float32)  # (3,3,Cin,Cout)
    kw = jnp.arange(KW)[:, None, None]
    wp = jnp.arange(W + 2)[None, :, None]
    wo = jnp.arange(W)[None, None, :]
    ind = (wp == wo + kw).astype(jnp.float32)                  # (3, W+2, W) band mask
    big = jnp.einsum('kpw,hkio->hpiwo', ind, w_hwio)           # (3, W+2, Cin, W, Cout)
    return big.reshape(KH * (W + 2) * Cin, W * Cout)


def conv_batchnorm_relu(x_nchw, w_oihw, bias, gamma, beta, eps=1e-5,
                        matmul_dtype=jnp.bfloat16):
    """Conv2d(3x3, pad=1) -> BatchNorm2d (batch stats) -> ReLU.  NCHW in/out."""
    N, Cin, H, W = x_nchw.shape
    Cout = w_oihw.shape[0]
    WC = W * Cout
    WPC = (W + 2) * Cin
    K = 3 * WPC
    NH = N * H

    # ---- layout plumbing on the (small) input side ----
    x_nhwc = jnp.transpose(x_nchw, (0, 2, 3, 1)).astype(jnp.float32)
    x_pad = jnp.pad(x_nhwc, ((0, 0), (1, 1), (1, 1), (0, 0)))
    x_flat = x_pad.reshape(N, H + 2, WPC)                      # channels in the lane axis
    # Pre-stack the three kh row windows -> every kernel block read is aligned and
    # halo-free; rows across (n, h) are independent so they flatten into one M axis.
    x_stk = jnp.concatenate([x_flat[:, kh:kh + H, :] for kh in range(3)], axis=-1)
    x_rows = x_stk.reshape(NH, K).astype(matmul_dtype)         # (N*H, 3*(W+2)*Cin) bf16

    w_big = _banded_weight(w_oihw, W).astype(matmul_dtype)     # (K, W*Cout) bf16

    bias_t = jnp.tile(bias.astype(jnp.float32), W).reshape(1, WC)
    gamma_t = jnp.tile(gamma.astype(jnp.float32), W).reshape(1, WC)
    beta_t = jnp.tile(beta.astype(jnp.float32), W).reshape(1, WC)

    # 0/1 matrix that sums per-(w, cout) lane stats over the W groups per cout and
    # broadcasts the total back to every lane (one MXU matmul inside the kernel).
    lane_cout = jnp.arange(WC, dtype=jnp.int32) % Cout
    group_sum = (lane_cout[:, None] == lane_cout[None, :]).astype(jnp.float32)

    # Rows per grid step: as large as is reasonable (amortize ~0.35us/step, fill MXU
    # rows); must divide N*H.  At the test shape this is the full 32 rows, 1 step.
    if NH <= 512:
        TR = NH
    else:
        TR = next((c for c in range(512, 7, -8) if NH % c == 0), NH)
    T = NH // TR

    kern = functools.partial(_conv_bn_relu_kernel, tr=TR,
                             inv_n=1.0 / float(N * H * W), eps=float(eps))

    # Explicit VMEM budget (double-buffered input tile + constants + resident output).
    itm = jnp.dtype(matmul_dtype).itemsize
    vmem_bytes = (2 * TR * K * itm + K * WC * itm + 3 * WC * 4 + WC * WC * 4
                  + NH * WC * 4 + 8 * WC * 4)
    vmem_limit = int(min(max(4 * vmem_bytes, 8 << 20), 64 << 20))

    out_flat = pl.pallas_call(
        kern,
        out_shape=jax.ShapeDtypeStruct((NH, WC), jnp.float32),
        grid_spec=pltpu.PrefetchScalarGridSpec(
            num_scalar_prefetch=0,
            grid=(T,),
            in_specs=[
                pl.BlockSpec((TR, K), lambda t: (t, 0)),        # row tile (only moving block)
                pl.BlockSpec((K, WC), lambda t: (0, 0)),        # conv weight (constant)
                pl.BlockSpec((1, WC), lambda t: (0, 0)),        # bias
                pl.BlockSpec((1, WC), lambda t: (0, 0)),        # gamma
                pl.BlockSpec((1, WC), lambda t: (0, 0)),        # beta
                pl.BlockSpec((WC, WC), lambda t: (0, 0)),       # group-sum matrix
            ],
            # Full output stays resident in VMEM across the grid (accumulator pattern);
            # it is written back to HBM exactly once, after the in-place normalize.
            out_specs=pl.BlockSpec((NH, WC), lambda t: (0, 0)),
            scratch_shapes=[pltpu.VMEM((8, WC), jnp.float32)],  # BN sum / sumsq
        ),
        compiler_params=pltpu.CompilerParams(
            dimension_semantics=("arbitrary",),
            vmem_limit_bytes=vmem_limit),
    )(x_rows, w_big, bias_t, gamma_t, beta_t, group_sum)

    # back to PyTorch's NCHW (interface requirement; one XLA transpose)
    return jnp.transpose(out_flat.reshape(N, H, W, Cout), (0, 3, 1, 2))


# ---------------------------- Reference (plain JAX) ------------------------

def reference(x_nchw, w_oihw, bias, gamma, beta, eps=1e-5):
    y = jax.lax.conv_general_dilated(
        x_nchw, w_oihw, window_strides=(1, 1), padding="SAME",
        dimension_numbers=("NCHW", "OIHW", "NCHW"))
    y = y + bias[None, :, None, None]
    mean = y.mean(axis=(0, 2, 3), keepdims=True)
    var = ((y - mean) ** 2).mean(axis=(0, 2, 3), keepdims=True)
    yhat = (y - mean) / jnp.sqrt(var + eps)
    out = yhat * gamma[None, :, None, None] + beta[None, :, None, None]
    return jnp.maximum(out, 0.0)


# --------------------------------- Main ------------------------------------

if __name__ == "__main__":
    N, Cin, Cout, H, W = 2, 4, 8, 16, 16

    key = jax.random.PRNGKey(0)
    kx, kw, kb = jax.random.split(key, 3)

    x = jax.random.normal(kx, (N, Cin, H, W), dtype=jnp.float32)
    # Conv2d params (PyTorch conventions: weight OIHW, bias (Cout,))
    w = jax.random.normal(kw, (Cout, Cin, 3, 3), dtype=jnp.float32) * 0.1
    b = jax.random.normal(kb, (Cout,), dtype=jnp.float32) * 0.1
    # BatchNorm2d default init: gamma=1, beta=0
    gamma = jnp.ones((Cout,), dtype=jnp.float32)
    beta = jnp.zeros((Cout,), dtype=jnp.float32)

    fwd = jax.jit(conv_batchnorm_relu)
    out = fwd(x, w, b, gamma, beta)
    jax.block_until_ready(out)

    ref = reference(x, w, b, gamma, beta)
    # bf16 MXU operands vs an f32 reference -> tolerance loosened accordingly
    # (stats are still accumulated in f32 from the f32 matmul accumulator).
    np.testing.assert_allclose(np.asarray(out), np.asarray(ref),
                               rtol=2e-2, atol=2e-2)

    print("KERNEL_OK")
</pallas_src>

<mosaic_0001>
module attributes {stable_mosaic.version = 11 : i64} {
  func.func @_conv_bn_relu_kernel(%arg0: i32, %arg1: memref<32x216xbf16, #tpu.memory_space<vmem>>, %arg2: memref<216x128xbf16, #tpu.memory_space<vmem>>, %arg3: memref<1x128xf32, #tpu.memory_space<vmem>>, %arg4: memref<1x128xf32, #tpu.memory_space<vmem>>, %arg5: memref<1x128xf32, #tpu.memory_space<vmem>>, %arg6: memref<128x128xf32, #tpu.memory_space<vmem>>, %arg7: memref<32x128xf32, #tpu.memory_space<vmem>>, %arg8: memref<8x128xf32, #tpu.memory_space<vmem>>) attributes {dimension_semantics = [#tpu.dimension_semantics<arbitrary>], iteration_bounds = array<i64: 1>, scalar_prefetch = 0 : i64, scratch_operands = 1 : i64, tpu.core_type = #tpu.core_type<tc>, window_params = [{transform_indices = @transform_0, window_bounds = array<i64: 32, 216>}, {pipeline_mode = #tpu.pipeline_mode<synchronous>, transform_indices = @transform_1, window_bounds = array<i64: 216, 128>}, {pipeline_mode = #tpu.pipeline_mode<synchronous>, transform_indices = @transform_2, window_bounds = array<i64: 1, 128>}, {pipeline_mode = #tpu.pipeline_mode<synchronous>, transform_indices = @transform_3, window_bounds = array<i64: 1, 128>}, {pipeline_mode = #tpu.pipeline_mode<synchronous>, transform_indices = @transform_4, window_bounds = array<i64: 1, 128>}, {pipeline_mode = #tpu.pipeline_mode<synchronous>, transform_indices = @transform_5, window_bounds = array<i64: 128, 128>}, {pipeline_mode = #tpu.pipeline_mode<synchronous>, transform_indices = @transform_6, window_bounds = array<i64: 32, 128>}]} {
    %c0 = arith.constant 0 : index
    %c0_0 = arith.constant 0 : index
    %0 = vector.load %arg1[%c0, %c0_0] : memref<32x216xbf16, #tpu.memory_space<vmem>>, vector<32x216xbf16>
    %c0_1 = arith.constant 0 : index
    %c0_2 = arith.constant 0 : index
    %1 = vector.load %arg2[%c0_1, %c0_2] : memref<216x128xbf16, #tpu.memory_space<vmem>>, vector<216x128xbf16>
    %cst = arith.constant dense<0.000000e+00> : vector<32x128xf32>
    %2 = tpu.matmul %0, %1, %cst {dimension_numbers = #tpu.dot_dimension_numbers<[1], [0], [0], [1], [0, 0, 1, 1], [], []>} : vector<32x216xbf16>, vector<216x128xbf16>, vector<32x128xf32> -> vector<32x128xf32>
    %c0_3 = arith.constant 0 : index
    %c0_4 = arith.constant 0 : index
    %3 = vector.load %arg3[%c0_3, %c0_4] : memref<1x128xf32, #tpu.memory_space<vmem>>, vector<1x128xf32>
    %4 = vector.broadcast %3 : vector<1x128xf32> to vector<32x128xf32>
    %5 = arith.addf %2, %4 : vector<32x128xf32>
    %c32_i32 = arith.constant 32 : i32
    %6 = arith.muli %arg0, %c32_i32 : i32
    %7 = tpu.assume_multiple %6, 32 : i32
    %8 = arith.index_cast %7 : i32 to index
    %c0_5 = arith.constant 0 : index
    %9 = vector.load %arg7[%8, %c0_5] : memref<32x128xf32, #tpu.memory_space<vmem>>, vector<32x128xf32>
    tpu.vector_store %arg7[%8, %c0_5], %5 {strides = array<i32>} : memref<32x128xf32, #tpu.memory_space<vmem>>, vector<32x128xf32>,
    %c0_i32 = arith.constant 0 : i32
    %10 = arith.cmpi eq, %arg0, %c0_i32 : i32
    %11 = arith.extui %10 : i1 to i32
    %c0_i32_6 = arith.constant 0 : i32
    %12 = arith.cmpi ne, %11, %c0_i32_6 : i32
    scf.if %12 {
      %cst_18 = arith.constant 0.000000e+00 : f32
      %27 = vector.broadcast %cst_18 : f32 to vector<8x128xf32>
      %c0_19 = arith.constant 0 : index
      %c0_20 = arith.constant 0 : index
      %28 = vector.load %arg8[%c0_19, %c0_20] : memref<8x128xf32, #tpu.memory_space<vmem>>, vector<8x128xf32>
      tpu.vector_store %arg8[%c0_19, %c0_20], %27 {strides = array<i32>} : memref<8x128xf32, #tpu.memory_space<vmem>>, vector<8x128xf32>,
    } else {
    }
    %c0_7 = arith.constant 0 : index
    %c0_8 = arith.constant 0 : index
    %13 = vector.load %arg8[%c0_7, %c0_8] : memref<8x128xf32, #tpu.memory_space<vmem>>, vector<1x128xf32>
    %cst_9 = arith.constant dense<0.000000e+00> : vector<128xf32>
    %14 = vector.multi_reduction <add>, %5, %cst_9 [0] : vector<32x128xf32> to vector<128xf32>
    %15 = vector.shape_cast %14 : vector<128xf32> to vector<1x128xf32>
    %16 = arith.addf %13, %15 : vector<1x128xf32>
    %c0_10 = arith.constant 0 : index
    %c0_11 = arith.constant 0 : index
    %17 = vector.load %arg8[%c0_10, %c0_11] : memref<8x128xf32, #tpu.memory_space<vmem>>, vector<1x128xf32>
    tpu.vector_store %arg8[%c0_10, %c0_11], %16 {strides = array<i32>} : memref<8x128xf32, #tpu.memory_space<vmem>>, vector<1x128xf32>,
    %c1 = arith.constant 1 : index
    %c0_12 = arith.constant 0 : index
    %18 = vector.load %arg8[%c1, %c0_12] : memref<8x128xf32, #tpu.memory_space<vmem>>, vector<1x128xf32>
    %19 = arith.mulf %5, %5 : vector<32x128xf32>
    %cst_13 = arith.constant dense<0.000000e+00> : vector<128xf32>
    %20 = vector.multi_reduction <add>, %19, %cst_13 [0] : vector<32x128xf32> to vector<128xf32>
    %21 = vector.shape_cast %20 : vector<128xf32> to vector<1x128xf32>
    %22 = arith.addf %18, %21 : vector<1x128xf32>
    %c1_14 = arith.constant 1 : index
    %c0_15 = arith.constant 0 : index
    %23 = vector.load %arg8[%c1_14, %c0_15] : memref<8x128xf32, #tpu.memory_space<vmem>>, vector<1x128xf32>
    tpu.vector_store %arg8[%c1_14, %c0_15], %22 {strides = array<i32>} : memref<8x128xf32, #tpu.memory_space<vmem>>, vector<1x128xf32>,
    %c0_i32_16 = arith.constant 0 : i32
    %24 = arith.cmpi eq, %arg0, %c0_i32_16 : i32
    %25 = arith.extui %24 : i1 to i32
    %c0_i32_17 = arith.constant 0 : i32
    %26 = arith.cmpi ne, %25, %c0_i32_17 : i32
    scf.if %26 {
      %c0_18 = arith.constant 0 : index
      %c0_19 = arith.constant 0 : index
      %27 = vector.load %arg8[%c0_18, %c0_19] : memref<8x128xf32, #tpu.memory_space<vmem>>, vector<8x128xf32>
      %c0_20 = arith.constant 0 : index
      %c0_21 = arith.constant 0 : index
      %28 = vector.load %arg6[%c0_20, %c0_21] : memref<128x128xf32, #tpu.memory_space<vmem>>, vector<128x128xf32>
      %cst_22 = arith.constant dense<0.000000e+00> : vector<8x128xf32>
      %29 = tpu.matmul %27, %28, %cst_22 {dimension_numbers = #tpu.dot_dimension_numbers<[1], [0], [0], [1], [0, 0, 1, 1], [], []>} : vector<8x128xf32>, vector<128x128xf32>, vector<8x128xf32> -> vector<8x128xf32>
      %30 = vector.extract_strided_slice %29 {offsets = [0, 0], sizes = [1, 128], strides = [1, 1]} : vector<8x128xf32> to vector<1x128xf32>
      %cst_23 = arith.constant 0.001953125 : f32
      %31 = vector.broadcast %cst_23 : f32 to vector<1x128xf32>
      %32 = arith.mulf %30, %31 : vector<1x128xf32>
      %33 = vector.extract_strided_slice %29 {offsets = [1, 0], sizes = [1, 128], strides = [1, 1]} : vector<8x128xf32> to vector<1x128xf32>
      %cst_24 = arith.constant 0.001953125 : f32
      %34 = vector.broadcast %cst_24 : f32 to vector<1x128xf32>
      %35 = arith.mulf %33, %34 : vector<1x128xf32>
      %36 = arith.mulf %32, %32 : vector<1x128xf32>
      %37 = arith.subf %35, %36 : vector<1x128xf32>
      %cst_25 = arith.constant 0.000000e+00 : f32
      %38 = vector.broadcast %cst_25 : f32 to vector<1x128xf32>
      %39 = arith.maximumf %37, %38 : vector<1x128xf32>
      %c0_26 = arith.constant 0 : index
      %c0_27 = arith.constant 0 : index
      %40 = vector.load %arg4[%c0_26, %c0_27] : memref<1x128xf32, #tpu.memory_space<vmem>>, vector<1x128xf32>
      %cst_28 = arith.constant 9.99999974E-6 : f32
      %41 = vector.broadcast %cst_28 : f32 to vector<1x128xf32>
      %42 = arith.addf %39, %41 : vector<1x128xf32>
      %43 = math.rsqrt %42 : vector<1x128xf32>
      %44 = arith.mulf %40, %43 : vector<1x128xf32>
      %c0_29 = arith.constant 0 : index
      %c0_30 = arith.constant 0 : index
      %45 = vector.load %arg5[%c0_29, %c0_30] : memref<1x128xf32, #tpu.memory_space<vmem>>, vector<1x128xf32>
      %46 = arith.mulf %32, %44 : vector<1x128xf32>
      %47 = arith.subf %45, %46 : vector<1x128xf32>
      %c0_31 = arith.constant 0 : index
      %c0_32 = arith.constant 0 : index
      %48 = vector.load %arg7[%c0_31, %c0_32] : memref<32x128xf32, #tpu.memory_space<vmem>>, vector<32x128xf32>
      %49 = vector.broadcast %44 : vector<1x128xf32> to vector<32x128xf32>
      %50 = arith.mulf %48, %49 : vector<32x128xf32>
      %51 = vector.broadcast %47 : vector<1x128xf32> to vector<32x128xf32>
      %52 = arith.addf %50, %51 : vector<32x128xf32>
      %cst_33 = arith.constant 0.000000e+00 : f32
      %53 = vector.broadcast %cst_33 : f32 to vector<32x128xf32>
      %54 = arith.maximumf %52, %53 : vector<32x128xf32>
      %c0_34 = arith.constant 0 : index
      %c0_35 = arith.constant 0 : index
      %55 = vector.load %arg7[%c0_34, %c0_35] : memref<32x128xf32, #tpu.memory_space<vmem>>, vector<32x128xf32>
      tpu.vector_store %arg7[%c0_34, %c0_35], %54 {strides = array<i32>} : memref<32x128xf32, #tpu.memory_space<vmem>>, vector<32x128xf32>,
    } else {
    }
    return
  }
  func.func @transform_0(%arg0: i32) -> (i32, i32) {
    %c0_i32 = arith.constant 0 : i32
    %c0_i32_0 = arith.constant 0 : i32
    return %arg0, %c0_i32 : i32, i32
  }
  func.func @transform_1(%arg0: i32) -> (i32, i32) {
    %c0_i32 = arith.constant 0 : i32
    %c0_i32_0 = arith.constant 0 : i32
    %c0_i32_1 = arith.constant 0 : i32
    return %c0_i32, %c0_i32_0 : i32, i32
  }
  func.func @transform_2(%arg0: i32) -> (i32, i32) {
    %c0_i32 = arith.constant 0 : i32
    %c0_i32_0 = arith.constant 0 : i32
    %c0_i32_1 = arith.constant 0 : i32
    return %c0_i32, %c0_i32_0 : i32, i32
  }
  func.func @transform_3(%arg0: i32) -> (i32, i32) {
    %c0_i32 = arith.constant 0 : i32
    %c0_i32_0 = arith.constant 0 : i32
    %c0_i32_1 = arith.constant 0 : i32
    return %c0_i32, %c0_i32_0 : i32, i32
  }
  func.func @transform_4(%arg0: i32) -> (i32, i32) {
    %c0_i32 = arith.constant 0 : i32
    %c0_i32_0 = arith.constant 0 : i32
    %c0_i32_1 = arith.constant 0 : i32
    return %c0_i32, %c0_i32_0 : i32, i32
  }
  func.func @transform_5(%arg0: i32) -> (i32, i32) {
    %c0_i32 = arith.constant 0 : i32
    %c0_i32_0 = arith.constant 0 : i32
    %c0_i32_1 = arith.constant 0 : i32
    return %c0_i32, %c0_i32_0 : i32, i32
  }
  func.func @transform_6(%arg0: i32) -> (i32, i32) {
    %c0_i32 = arith.constant 0 : i32
    %c0_i32_0 = arith.constant 0 : i32
    %c0_i32_1 = arith.constant 0 : i32
    return %c0_i32, %c0_i32_0 : i32, i32
  }
}

</mosaic_0001>

<bundles_post_ra>
// kernel: tile.18
= control target key start
LH: loop header
LB: loop body
LE: loop exit
PB: predicated region body
PF: predicated region fallthrough
CT: control target
= control target key end

     0   :  { %s28_s0 = inlined_call_operand.vmem [shape: f32[8], index: 0, kind: input, shape index: {}]   ;;  %s29_s1 = inlined_call_operand.vmem [shape: f32[16,8], index: 1, kind: output, shape index: {}]  }
   0x1   :  { %v4_v0 = vld [vmem:[%s28_s0] ss:$0 sm:$0xff] }
   0x2   :  { %5 = vst [vmem:[%s29_s1] sm:$0xff] %v4_v0  ;;  %8 = vst [vmem:[%s29_s1 + $0x8] sm:$0xff] %v4_v0 }

// kernel: tile.19
= control target key start
LH: loop header
LB: loop body
LE: loop exit
PB: predicated region body
PF: predicated region fallthrough
CT: control target
= control target key end

     0   :  { %s131_s10 = smov 120   ;;  %s132_s11 = smov 104   ;;  %vm3_vm0 = vcmask 64512   ;;  %vm9_vm1 = vcmask 1048512   ;;  %vm15_vm2 = vcmask 982912   ;;  %vm21_vm3 = vcmask 917312   ;;  %s207_s0 = inlined_call_operand.vmem [shape: f32[16,8], index: 0, kind: input, shape index: {}]   ;;  %s208_s1 = inlined_call_operand.vmem [shape: f32[1,128], index: 1, kind: output, shape index: {}]  }
   0x1   :  { %v101_v0 = vld [vmem:[%s207_s0 + $0xf] sm:$0x1]   ;;  %v103_v1 = vld [vmem:[%s207_s0 + $0xd] sm:$0x1]   ;;  %v102_v2 = vld [vmem:[%s207_s0 + $0xe] sm:$0x1]  }
   0x2   :  { %7 = vrot.lane.b32.xlu0 %v101_v0, %s131_s10  ;;  %19 = vrot.lane.b32.xlu1 %v103_v1, %s132_s11  ;;  %v104_v3 = vld [vmem:[%s207_s0 + $0xc] sm:$0x1]   ;;  %s133_s16 = smov 112   ;;  %s134_s17 = smov 96   ;;  %v105_v4 = vld [vmem:[%s207_s0 + $0xb] sm:$0x1]  }
   0x3   :  { %v106_v5 = vld [vmem:[%s207_s0 + $0xa] sm:$0x1]   ;;  %v2_v6 = vld [vmem:[%s207_s0] sm:$0x1]   ;;  %s135_s24 = smov 88   ;;  %s136_s25 = smov 80  }
   0x4   :  { %4 = vst.msk [vmem:[#allocation0] sm:$0x1] %vm3_vm0, %v2_v6   ;;  %v107_v7 = vld [vmem:[%s207_s0 + $0x9] sm:$0x1]   ;;  %v108_v8 = vld [vmem:[%s207_s0 + $0x8] sm:$0x1]  }
   0x5   :  { %s137_s30 = smov 72   ;;  %s138_s2 = smov 64   ;;  %v109_v9 = vld [vmem:[%s207_s0 + $0x7] sm:$0x1]   ;;  %v110_v10 = vld [vmem:[%s207_s0 + $0x6] sm:$0x1]  }
   0x6   :  { %13 = vrot.lane.b32.xlu0 %v102_v2, %s133_s16  ;;  %25 = vrot.lane.b32.xlu1 %v104_v3, %s134_s17  ;;  %s139_s7 = smov 56   ;;  %s140_s8 = smov 48   ;;  %v111_v11 = vld [vmem:[%s207_s0 + $0x5] sm:$0x1]   ;;  %v112_v12 = vld [vmem:[%s207_s0 + $0x4] sm:$0x1]  }
   0x7   :  { %s141_s13 = smov 40   ;;  %s142_s14 = smov 32   ;;  %v113_v13 = vld [vmem:[%s207_s0 + $0x3] sm:$0x1]   ;;  %v114_v14 = vld [vmem:[%s207_s0 + $0x2] sm:$0x1]  }
   0x8   :  { %s143_s19 = smov 24   ;;  %s144_s20 = smov 16   ;;  %v115_v15 = vld [vmem:[%s207_s0 + $0x1] sm:$0x1]   ;;  %vm27_vm4 = vcmask 851712   ;;  %vm33_vm5 = vcmask 786112  }
   0x9   :  { %s145_s0 = smov 8   ;;  %vm39_vm6 = vcmask 720512   ;;  %vm45_vm7 = vcmask 654912   ;;  %vm51_vm8 = vcmask 589312   ;;  %vm57_vm9 = vcmask 523712  }
   0xa   :  { %31 = vrot.lane.b32.xlu0 %v105_v4, %s135_s24  ;;  %37 = vrot.lane.b32.xlu1 %v106_v5, %s136_s25  ;;  %vm63_vm10 = vcmask 458112   ;;  %vm69_vm11 = vcmask 392512   ;;  %vm75_vm12 = vcmask 326912   ;;  %vm81_vm13 = vcmask 261312  }
   0xb   :  { %vm87_vm14 = vcmask 195712   ;;  %vm93_vm15 = vcmask 130112  }
   0xe   :  { %43 = vrot.lane.b32.xlu0 %v107_v7, %s137_s30  ;;  %49 = vrot.lane.b32.xlu1 %v108_v8, %s138_s2 }
  0x12   :  { %55 = vrot.lane.b32.xlu0 %v109_v9, %s139_s7  ;;  %61 = vrot.lane.b32.xlu1 %v110_v10, %s140_s8 }
  0x16   :  { %67 = vrot.lane.b32.xlu0 %v111_v11, %s141_s13  ;;  %73 = vrot.lane.b32.xlu1 %v112_v12, %s142_s14 }
  0x1a   :  { %79 = vrot.lane.b32.xlu0 %v113_v13, %s143_s19  ;;  %85 = vrot.lane.b32.xlu1 %v114_v14, %s144_s20 }
  0x1e   :  { %91 = vrot.lane.b32.xlu0 %v115_v15, %s145_s0 }
  0x74   :  { %v8_v16 = vpop.permute.xlu0 %7   ;;  %v20_v17 = vpop.permute.xlu1 %19  }
  0x75   :  { %10 = vst.msk [vmem:[#allocation0] sm:$0x1] %vm9_vm1, %v8_v16  }
  0x78   :  { %v14_v18 = vpop.permute.xlu0 %13   ;;  %v26_v19 = vpop.permute.xlu1 %25  }
  0x79   :  { %16 = vst.msk [vmem:[#allocation0] sm:$0x1] %vm15_vm2, %v14_v18  }
  0x7a   :  { %22 = vst.msk [vmem:[#allocation0] sm:$0x1] %vm21_vm3, %v20_v17  }
  0x7b   :  { %28 = vst.msk [vmem:[#allocation0] sm:$0x1] %vm27_vm4, %v26_v19  }
  0x7c   :  { %v32_v20 = vpop.permute.xlu0 %31   ;;  %v38_v21 = vpop.permute.xlu1 %37  }
  0x7d   :  { %34 = vst.msk [vmem:[#allocation0] sm:$0x1] %vm33_vm5, %v32_v20  }
  0x7e   :  { %40 = vst.msk [vmem:[#allocation0] sm:$0x1] %vm39_vm6, %v38_v21  }
  0x80   :  { %v44_v22 = vpop.permute.xlu0 %43   ;;  %v50_v23 = vpop.permute.xlu1 %49  }
  0x81   :  { %46 = vst.msk [vmem:[#allocation0] sm:$0x1] %vm45_vm7, %v44_v22  }
  0x82   :  { %52 = vst.msk [vmem:[#allocation0] sm:$0x1] %vm51_vm8, %v50_v23  }
  0x84   :  { %v56_v24 = vpop.permute.xlu0 %55   ;;  %v62_v25 = vpop.permute.xlu1 %61  }
  0x85   :  { %58 = vst.msk [vmem:[#allocation0] sm:$0x1] %vm57_vm9, %v56_v24  }
  0x86   :  { %64 = vst.msk [vmem:[#allocation0] sm:$0x1] %vm63_vm10, %v62_v25  }
  0x88   :  { %v68_v26 = vpop.permute.xlu0 %67   ;;  %v74_v27 = vpop.permute.xlu1 %73  }
  0x89   :  { %70 = vst.msk [vmem:[#allocation0] sm:$0x1] %vm69_vm11, %v68_v26  }
  0x8a   :  { %76 = vst.msk [vmem:[#allocation0] sm:$0x1] %vm75_vm12, %v74_v27  }
  0x8c   :  { %v80_v28 = vpop.permute.xlu0 %79   ;;  %v86_v29 = vpop.permute.xlu1 %85  }
  0x8d   :  { %82 = vst.msk [vmem:[#allocation0] sm:$0x1] %vm81_vm13, %v80_v28  }
  0x8e   :  { %88 = vst.msk [vmem:[#allocation0] sm:$0x1] %vm87_vm14, %v86_v29  }
  0x90   :  { %v92_v30 = vpop.permute.xlu0 %91  }
  0x91   :  { %94 = vst.msk [vmem:[#allocation0] sm:$0x1] %vm93_vm15, %v92_v30  }
  0x98   :  { %v98_v31 = vld [vmem:[#allocation0] sm:$0x1] }
  0x99   :  { %100 = vst [vmem:[%s208_s1] sm:$0x1] %v98_v31 }

// kernel: conv_batchnorm_relu.1
= control target key start
LH: loop header
LB: loop body
LE: loop exit
PB: predicated region body
PF: predicated region fallthrough
CT: control target
= control target key end

     0   :  { %v541_v0 = vmov 0   ;;  %vm161_vm0 = vcmask 719872   ;;  %vm168_vm1 = vcmask 1043456   ;;  %v542_v23 = vmov 0.0|0.0   ;;  %s718_s1 = inlined_call_operand.vmem [shape: bf16[216,128], index: 1, kind: input, shape index: {}]   ;;  %s719_s0 = inlined_call_operand.vmem [shape: bf16[32,216], index: 0, kind: input, shape index: {}]   ;;  %s720_s5 = inlined_call_operand.vmem [shape: f32[128,128], index: 5, kind: input, shape index: {}]   ;;  %s721_s2 = inlined_call_operand.vmem [shape: f32[1,128], index: 2, kind: input, shape index: {}]   ;;  %s722_s3 = inlined_call_operand.vmem [shape: f32[1,128], index: 3, kind: input, shape index: {}]   ;;  %s723_s4 = inlined_call_operand.vmem [shape: f32[1,128], index: 4, kind: input, shape index: {}]   ;;  %s724_s6 = inlined_call_operand.vmem [shape: f32[32,128], index: 6, kind: output, shape index: {}]  }
   0x1   :  { %172 = vmatprep.subr.bf16.mxu0 %v541_v0  ;;  %v519_v1 = vld [vmem:[%s718_s1] sm:$0xff]   ;;  %v520_v2 = vld [vmem:[%s718_s1 + $0x8] sm:$0xff]   ;;  %v521_v3 = vld [vmem:[%s718_s1 + $0x10] sm:$0xff]   ;;  %490 = vmatprep.subr.bf16.mxu1 %v542_v23  ;;  %v543_v33 = vmov 0.0   ;;  %vm544_vm2 = vmmov 0  }
   0x2   :  { %173 = vmatpush1.bf16.msra.mxu0 %v519_v1  ;;  %v522_v4 = vld [vmem:[%s718_s1 + $0x18] sm:$0xff]   ;;  %v523_v5 = vld [vmem:[%s718_s1 + $0x20] sm:$0xff]   ;;  %v524_v7 = vld [vmem:[%s718_s1 + $0x28] sm:$0xff]   ;;  %231 = vst [vmem:[#allocation2] sm:$0xff] %v543_v33  ;;  %487 = vmatprep.mubr.msk.f32.mxu1 %vm544_vm2, %v543_v33 }
   0x3   :  { %174 = vmatprep.subr.bf16.mxu0 %v541_v0  ;;  %v535_v6 = vld [vmem:[%s719_s0 + $0x4] ss:$8 sps:$4 sm:$0xff]   ;;  %v525_v8 = vld [vmem:[%s718_s1 + $0x30] sm:$0xff]   ;;  %v526_v9 = vld [vmem:[%s718_s1 + $0x38] sm:$0xff]  }
   0x4   :  { %436 = vmatprep.mubr.msk.bf16.mxu0 %vm161_vm0, %v535_v6  ;;  %v527_v10 = vld [vmem:[%s718_s1 + $0x40] sm:$0xff]   ;;  %v528_v11 = vld [vmem:[%s718_s1 + $0x48] sm:$0xff]   ;;  %v529_v12 = vld [vmem:[%s718_s1 + $0x50] sm:$0xff]  }
   0x5   :  { %v530_v13 = vld [vmem:[%s718_s1 + $0x58] sm:$0xff]   ;;  %v531_v14 = vld [vmem:[%s718_s1 + $0x60] sm:$0xff]   ;;  %v532_v15 = vld [vmem:[%s718_s1 + $0x68] ss:$0 sps:$4 sm:$0xff]  }
   0x6   :  { %175 = vmatpush1.bf16.msra.mxu0 %v520_v2  ;;  %v170_v16 = vsel %vm168_vm1, %v532_v15, 0  ;;  %v533_v17 = vld [vmem:[%s719_s0] ss:$8 sps:$4 sm:$0xff]   ;;  %v536_v18 = vld [vmem:[%s719_s0 + $0x14] ss:$8 sps:$4 sm:$0xff]  }
   0x7   :  { %176 = vmatprep.subr.bf16.mxu0 %v541_v0  ;;  %v538_v19 = vld [vmem:[%s719_s0 + $0x10] ss:$8 sps:$4 sm:$0xff]   ;;  %v264_v20 = vld [vmem:[%s720_s5] sm:$0xff]  ;;  %v265_v21 = vld [vmem:[%s720_s5 + $0x8] sm:$0xff] }
   0x8   :  { %v491_v22 = vpack.c.bf16 %v265_v21, %v264_v20  ;;  %v266_v24 = vld [vmem:[%s720_s5 + $0x10] sm:$0xff]  ;;  %v267_v25 = vld [vmem:[%s720_s5 + $0x18] sm:$0xff]  ;;  %v268_v27 = vld [vmem:[%s720_s5 + $0x20] sm:$0xff] }
   0x9   :  { %v494_v26 = vpack.c.bf16 %v267_v25, %v266_v24  ;;  %v269_v28 = vld [vmem:[%s720_s5 + $0x28] sm:$0xff]  ;;  %v270_v30 = vld [vmem:[%s720_s5 + $0x30] sm:$0xff]  ;;  %v271_v31 = vld [vmem:[%s720_s5 + $0x38] sm:$0xff] }
   0xa   :  { %177 = vmatpush1.bf16.msra.mxu0 %v521_v3  ;;  %492 = vmatpush3.bf16.msra.mxu1 %v491_v22  ;;  %v497_v29 = vpack.c.bf16 %v269_v28, %v268_v27  ;;  %v500_v32 = vpack.c.bf16 %v271_v31, %v270_v30  ;;  %v272_v34 = vld [vmem:[%s720_s5 + $0x40] sm:$0xff]  ;;  %v273_v35 = vld [vmem:[%s720_s5 + $0x48] sm:$0xff]  ;;  %v274_v37 = vld [vmem:[%s720_s5 + $0x50] sm:$0xff]  ;;  %v545_v30 = vmov 1966171168  }
   0xb   :  { %178 = vmatprep.subr.bf16.mxu0 %v541_v0  ;;  %493 = vmatprep.subr.bf16.mxu1 %v542_v23  ;;  %v503_v36 = vpack.c.bf16 %v273_v35, %v272_v34  ;;  %v275_v38 = vld [vmem:[%s720_s5 + $0x58] sm:$0xff]  ;;  %v276_v39 = vld [vmem:[%s720_s5 + $0x60] sm:$0xff]  ;;  %v277_v41 = vld [vmem:[%s720_s5 + $0x68] sm:$0xff]  ;;  %v362_v31 = vunpack.c.l.s4 %v545_v30 }
   0xc   :  { %v506_v40 = vpack.c.bf16 %v275_v38, %v274_v37  ;;  %v509_v42 = vpack.c.bf16 %v277_v41, %v276_v39  ;;  %v278_v43 = vld [vmem:[%s720_s5 + $0x70] sm:$0xff]  ;;  %v279_v44 = vld [vmem:[%s720_s5 + $0x78] sm:$0xff]  ;;  %v417_v48 = vld [vmem:[%s721_s2] ss:$0 sm:$0xff] }
   0xd   :  { %v512_v45 = vpack.c.bf16 %v279_v44, %v278_v43  ;;  %v363_v33 = vunpack.c.0.s8 %v362_v31  ;;  %v357_v39 = vld [vmem:[%s722_s3] sm:$0x1] }
   0xe   :  { %179 = vmatpush1.bf16.msra.mxu0 %v522_v4  ;;  %495 = vmatpush3.bf16.msra.mxu1 %v494_v26  ;;  %v378_v43 = vld [vmem:[%s723_s4] sm:$0x1] }
   0xf   :  { %180 = vmatprep.subr.bf16.mxu0 %v541_v0  ;;  %496 = vmatprep.subr.bf16.mxu1 %v542_v23 }
  0x12   :  { %181 = vmatpush1.bf16.msra.mxu0 %v523_v5  ;;  %498 = vmatpush3.bf16.msra.mxu1 %v497_v29 }
  0x13   :  { %182 = vmatprep.subr.bf16.mxu0 %v541_v0  ;;  %499 = vmatprep.subr.bf16.mxu1 %v542_v23 }
  0x16   :  { %183 = vmatpush1.bf16.msra.mxu0 %v524_v7  ;;  %501 = vmatpush3.bf16.msra.mxu1 %v500_v32  ;;  %v364_v32 = vlaneseq }
  0x17   :  { %184 = vmatprep.subr.bf16.mxu0 %v541_v0  ;;  %502 = vmatprep.subr.bf16.mxu1 %v542_v23 }
  0x18   :  { %v365_v34 = vshrl.u32 %v364_v32, 7 }
  0x1a   :  { %185 = vmatpush1.bf16.msra.mxu0 %v525_v8  ;;  %504 = vmatpush3.bf16.msra.mxu1 %v503_v36  ;;  %v366_v35 = vsub.s32 %v363_v33, %v365_v34  ;;  %v388_v41 = vsub.s32 0, %v365_v34 }
  0x1b   :  { %186 = vmatprep.subr.bf16.mxu0 %v541_v0  ;;  %505 = vmatprep.subr.bf16.mxu1 %v542_v23 }
  0x1e   :  { %187 = vmatpush1.bf16.msra.mxu0 %v526_v9  ;;  %507 = vmatpush3.bf16.msra.mxu1 %v506_v40 }
  0x1f   :  { %188 = vmatprep.subr.bf16.mxu0 %v541_v0  ;;  %508 = vmatprep.subr.bf16.mxu1 %v542_v23 }
  0x22   :  { %189 = vmatpush1.bf16.msra.mxu0 %v527_v10  ;;  %510 = vmatpush3.bf16.msra.mxu1 %v509_v42 }
  0x23   :  { %190 = vmatprep.subr.bf16.mxu0 %v541_v0  ;;  %511 = vmatprep.subr.bf16.mxu1 %v542_v23 }
  0x26   :  { %191 = vmatpush1.bf16.msra.mxu0 %v528_v11  ;;  %513 = vmatpush3.bf16.msra.mxu1 %v512_v45 }
  0x27   :  { %192 = vmatprep.subr.bf16.mxu0 %v541_v0 }
  0x2a   :  { %193 = vmatpush1.bf16.msra.mxu0 %v529_v12 }
  0x2b   :  { %194 = vmatprep.subr.bf16.mxu0 %v541_v0 }
  0x2e   :  { %195 = vmatpush1.bf16.msra.mxu0 %v530_v13 }
  0x2f   :  { %196 = vmatprep.subr.bf16.mxu0 %v541_v0 }
  0x32   :  { %197 = vmatpush1.bf16.msra.mxu0 %v531_v14  ;;  %v232_v14 = vld [vmem:[#allocation2] sm:$0x1] }
  0x33   :  { %198 = vmatprep.subr.bf16.mxu0 %v541_v0 }
  0x36   :  { %199 = vmatpush1.bf16.msra.mxu0 %v170_v16 }
  0x39   :  { %205 = vmatmul.mubr.bf16.vlgmr.msra.gmra.mrb[0].mxu0 %v533_v17  ;;  %v244_v17 = vld [vmem:[#allocation2 + $0x1] sm:$0x1] }
  0x3a   :  { %437 = vmatprep.mubr.msk.bf16.mxu0 %vm161_vm0, %v536_v18 }
  0x41   :  { %213 = vmatmul.mubr.bf16.gmra.mrb[4].mxu0 %v538_v19 }
 0x10c   :  { %v206_v46 = vpop.f32.mrb[0].mxu0 }
 0x10d   :  { %v208_v47 = vpop.f32.mrb[1].mxu0  ;;  %v690_v52 = vadd.f32 %v417_v48, %v206_v46 }
 0x10e   :  { %v209_v49 = vpop.f32.mrb[2].mxu0 }
 0x10f   :  { %v688_v50 = vadd.f32 %v417_v48, %v209_v49  ;;  %v211_v51 = vpop.f32.mrb[3].mxu0  ;;  %v245_v55 = vmul.f32 %v690_v52, %v690_v52 }
 0x111   :  { %v246_v53 = vmul.f32 %v688_v50, %v688_v50  ;;  %v233_v56 = vadd.f32 %v688_v50, %v690_v52 }
 0x113   :  { %v249_v60 = vadd.f32 %v246_v53, %v245_v55 }
 0x114   :  { %v214_v54 = vpop.f32.mrb[4].mxu0 }
 0x115   :  { %v215_v57 = vadd.f32 %v417_v48, %v214_v54  ;;  %v216_v58 = vpop.f32.mrb[5].mxu0 }
 0x116   :  { %v217_v59 = vpop.f32.mrb[6].mxu0 }
 0x117   :  { %v234_v61 = vadd.f32 %v233_v56, %v215_v57  ;;  %v247_v62 = vmul.f32 %v215_v57, %v215_v57  ;;  %v218_v63 = vadd.f32 %v417_v48, %v217_v59  ;;  %v219_v0 = vpop.f32.mrb[7].mxu0 }
 0x119   :  { %v250_v1 = vadd.f32 %v249_v60, %v247_v62  ;;  %v235_v2 = vadd.f32 %v234_v61, %v218_v63  ;;  %v248_v3 = vmul.f32 %v218_v63, %v218_v63 }
 0x11b   :  { %v236_v4 = vrot.slane %v235_v2, 4  ;;  %v251_v5 = vadd.f32 %v250_v1, %v248_v3 }
 0x11d   :  { %v237_v6 = vadd.f32 %v236_v4, %v235_v2  ;;  %v252_v7 = vrot.slane %v251_v5, 4 }
 0x11f   :  { %v238_v8 = vrot.slane %v237_v6, 2  ;;  %v253_v9 = vadd.f32 %v252_v7, %v251_v5 }
 0x121   :  { %v239_v10 = vadd.f32 %v238_v8, %v237_v6  ;;  %v254_v11 = vrot.slane %v253_v9, 2 }
 0x123   :  { %v240_v12 = vrot.slane %v239_v10, 1  ;;  %v255_v13 = vadd.f32 %v254_v11, %v253_v9 }
 0x125   :  { %v241_v15 = vadd.f32 %v240_v12, %v239_v10  ;;  %v256_v16 = vrot.slane %v255_v13, 1 }
 0x127   :  { %v242_v18 = vadd.f32 %v241_v15, %v232_v14  ;;  %v257_v19 = vadd.f32 %v256_v16, %v255_v13 }
 0x129   :  { %243 = vst [vmem:[#allocation2] sm:$0x1] %v242_v18  ;;  %v258_v20 = vadd.f32 %v257_v19, %v244_v17 }
 0x12b   :  { %259 = vst [vmem:[#allocation2 + $0x1] sm:$0x1] %v258_v20 }
 0x132   :  { %v263_v21 = vld [vmem:[#allocation2] sm:$0xff] }
 0x133   :  { %488 = vmatmul.mubr.f32.vlgmr.msra.gmra.mrb[0].mxu1 %v263_v21 }
 0x206   :  { %v346_v22 = vpop.f32.mrb[0].mxu1 }
 0x207   :  { %v350_v23 = vmul.f32 0.001953125, %v346_v22  ;;  %v489_v24 = vpop.f32.mrb[1].mxu1 }
 0x209   :  { %v351_v25 = vmul.f32 %v350_v23, %v350_v23 }
 0x20b   :  { %v353_v26 = vrot.slane %v351_v25, 7 }
 0x20d   :  { %v355_v27 = vsub.f32 %v350_v23, %v353_v26 }
 0x20f   :  { %v356_v28 = vmax.f32 %v355_v27, 0.0 }
 0x211   :  { %v358_v29 = vadd.f32 1e-05, %v356_v28 }
 0x213   :  { %539 = vrsqrt.f32 %v358_v29 }
 0x21d   :  { %v540_v36 = vpop.eup %539 }
 0x21e   :  { %v367_v37 = vrot.slane %v540_v36, %v366_v35 }
 0x220   :  { %v368_v38 = vcombine.high %v367_v37, %v367_v37 }
 0x222   :  { %v375_v40 = vrot.slane %v368_v38, %v366_v35 }
 0x224   :  { %v377_v42 = vmul.f32 %v375_v40, %v357_v39 }
 0x226   :  { %v379_v44 = vmul.f32 %v377_v42, %v350_v23  ;;  %v389_v45 = vrot.slane %v377_v42, %v388_v41 }
 0x228   :  { %v380_v46 = vsub.f32 %v378_v43, %v379_v44  ;;  %v391_v47 = vmul.f32 %v389_v45, %v690_v52  ;;  %v392_v48 = vmul.f32 %v389_v45, %v688_v50  ;;  %v393_v49 = vmul.f32 %v389_v45, %v215_v57 }
 0x229   :  { %v394_v51 = vmul.f32 %v389_v45, %v218_v63 }
 0x22a   :  { %v399_v53 = vrot.slane %v380_v46, %v388_v41 }
 0x22c   :  { %v401_v54 = vadd.f32 %v399_v53, %v391_v47  ;;  %v402_v55 = vadd.f32 %v399_v53, %v392_v48  ;;  %v403_v56 = vadd.f32 %v399_v53, %v393_v49  ;;  %v404_v58 = vadd.f32 %v399_v53, %v394_v51 }
 0x22e   :  { %v405_v59 = vmax.f32 %v401_v54, 0.0  ;;  %v406_v60 = vmax.f32 %v402_v55, 0.0  ;;  %v407_v61 = vmax.f32 %v403_v56, 0.0  ;;  %v408_v62 = vmax.f32 %v404_v58, 0.0 }
 0x230   :  { %409 = vst [vmem:[%s724_s6] sm:$0xff] %v405_v59  ;;  %410 = vst [vmem:[%s724_s6 + $0x8] sm:$0xff] %v406_v60 }
 0x231   :  { %411 = vst [vmem:[%s724_s6 + $0x10] sm:$0xff] %v407_v61  ;;  %412 = vst [vmem:[%s724_s6 + $0x18] sm:$0xff] %v408_v62 }

</bundles_post_ra>
